<compile_context>
chip_gen: v5e
topology: v5e:2x2
jax: 0.10.0
libtpu: 0.0.40
codegen_flags: <defaults>
</compile_context>

<pallas_src>
import functools

import jax
import jax.numpy as jnp
from jax.experimental import pallas as pl
from jax.experimental.pallas import tpu as pltpu


def _round_up(n, m):
    return -(-n // m) * m


# ------------------------------ glue helpers -------------------------------- #

def _im2col_t(x_nchw, KH, KW, padding, k_pad):
    """NCHW -> (K_pad, B*OH*OW) patches^T, feature order (kh, kw, c).

    The K -> K_pad zero pad is appended as one extra block before the concat
    (no second full-array pad pass)."""
    B, C, H, W = x_nchw.shape
    x = jnp.transpose(x_nchw, (0, 2, 3, 1))  # NHWC
    if padding:
        x = jnp.pad(x, ((0, 0), (padding, padding), (padding, padding), (0, 0)))
    Hp, Wp = x.shape[1], x.shape[2]
    OH, OW = Hp - KH + 1, Wp - KW + 1
    BP = B * OH * OW
    cols = []
    for i in range(KH):
        for j in range(KW):
            tap = x[:, i:i + OH, j:j + OW, :]                       # (B, OH, OW, C)
            cols.append(jnp.transpose(tap, (3, 0, 1, 2)).reshape(C, BP))
    K = KH * KW * C
    if k_pad > K:
        cols.append(jnp.zeros((k_pad - K, BP), x.dtype))
    patches_t = jnp.concatenate(cols, axis=0)                       # (K_pad, BP)
    return patches_t, OH, OW


def _flat_weight_t(weight_oihw, o_pad, k_pad):
    """(O, C, KH, KW) -> (O_pad, K_pad), column order matching _im2col_t."""
    O, C, KH, KW = weight_oihw.shape
    K = KH * KW * C
    w = jnp.transpose(weight_oihw, (0, 2, 3, 1)).reshape(O, K)      # (O, K)
    return jnp.pad(w, ((0, o_pad - O), (0, k_pad - K)))


# -------------------------------- kernels ----------------------------------- #

def _conv_kernel(w_ref, p_ref, out_ref):
    # w_ref: (Op, Kp) bf16 (resident)   p_ref: (Kp, TN) bf16   out_ref: (Op, TN) f32
    out_ref[...] = jnp.dot(
        w_ref[...], p_ref[...], preferred_element_type=jnp.float32
    ).astype(out_ref.dtype)


def _conv_ce_kernel(w_ref, p_ref, tgt_ref, out_ref, loss_ref, *,
                    num_classes, num_rows, tile_n):
    # w_ref: (Op, Kp) bf16   p_ref: (Kp, TN) bf16   tgt_ref: (1, TN) int32
    # out_ref: (Op, TN) f32 logits   loss_ref: (1, TN) f32 per-position loss
    logits = jnp.dot(w_ref[...], p_ref[...], preferred_element_type=jnp.float32)
    out_ref[...] = logits.astype(out_ref.dtype)

    # Cross-entropy epilogue in f32; classes live on the short sublane axis.
    cls = jax.lax.broadcasted_iota(jnp.int32, logits.shape, dimension=0)
    cls_valid = cls < num_classes
    masked = jnp.where(cls_valid, logits, jnp.float32(-1e30))
    m = jnp.max(masked, axis=0, keepdims=True)
    lse = jnp.log(jnp.sum(jnp.exp(masked - m), axis=0, keepdims=True)) + m
    onehot = (cls == tgt_ref[...]).astype(jnp.float32)
    picked = jnp.sum(logits * onehot, axis=0, keepdims=True)

    # Mask positions beyond the true B*P (zero-padded tail of the last tile).
    pos = pl.program_id(0) * tile_n + jax.lax.broadcasted_iota(
        jnp.int32, (1, logits.shape[1]), dimension=1)
    pos_valid = (pos < num_rows).astype(jnp.float32)
    loss_ref[...] = (lse - picked) * pos_valid


# ------------------------------ forward pass -------------------------------- #

def conv_probe_forward(x_nchw, weight_oihw, padding=0, targets=None, *,
                       block_n=512, compute_dtype=jnp.bfloat16):
    B, C, H, W = x_nchw.shape
    O, Cw, KH, KW = weight_oihw.shape
    assert C == Cw

    K = KH * KW * C
    Kp = _round_up(K, 16)       # contraction dim on the sublane axis (bf16 packing)
    Op = _round_up(O, 16)       # class dim on the sublane axis

    patches_t, OH, OW = _im2col_t(x_nchw, KH, KW, padding, Kp)      # (Kp, BP)
    P = OH * OW
    BP = B * P

    # Lane tile: multiple of 128, <= block_n, and BP padded to a tile multiple.
    TN = _round_up(max(min(block_n, _round_up(BP, 128)), 128), 128)
    BPp = _round_up(BP, TN)
    G = BPp // TN

    patches_t = jnp.pad(patches_t, ((0, 0), (0, BPp - BP))).astype(compute_dtype)
    w_t = _flat_weight_t(weight_oihw, Op, Kp).astype(compute_dtype)

    itemsize = jnp.dtype(compute_dtype).itemsize
    cparams = pltpu.CompilerParams(dimension_semantics=("parallel",))

    w_spec = pl.BlockSpec((Op, Kp), lambda i: (0, 0))   # resident across the grid
    p_spec = pl.BlockSpec((Kp, TN), lambda i: (0, i))
    o_spec = pl.BlockSpec((Op, TN), lambda i: (0, i))

    if targets is None:
        out_padded = pl.pallas_call(
            _conv_kernel,
            grid=(G,),
            in_specs=[w_spec, p_spec],
            out_specs=o_spec,
            out_shape=jax.ShapeDtypeStruct((Op, BPp), jnp.float32),
            compiler_params=cparams,
            cost_estimate=pl.CostEstimate(
                flops=2 * Op * Kp * BPp,
                transcendentals=0,
                bytes_accessed=(Kp * BPp + Op * Kp) * itemsize + Op * BPp * 4),
        )(w_t, patches_t)
        loss = None
    else:
        assert targets.shape[0] == B
        tgt = jnp.pad(targets.reshape(1, BP).astype(jnp.int32),
                      ((0, 0), (0, BPp - BP)))
        t_spec = pl.BlockSpec((1, TN), lambda i: (0, i))
        l_spec = pl.BlockSpec((1, TN), lambda i: (0, i))
        out_padded, loss_vec = pl.pallas_call(
            functools.partial(_conv_ce_kernel, num_classes=O, num_rows=BP,
                              tile_n=TN),
            grid=(G,),
            in_specs=[w_spec, p_spec, t_spec],
            out_specs=(o_spec, l_spec),
            out_shape=(jax.ShapeDtypeStruct((Op, BPp), jnp.float32),
                       jax.ShapeDtypeStruct((1, BPp), jnp.float32)),
            compiler_params=cparams,
            cost_estimate=pl.CostEstimate(
                flops=2 * Op * Kp * BPp,
                transcendentals=Op * BPp,
                bytes_accessed=(Kp * BPp + Op * Kp) * itemsize
                               + (Op + 1) * BPp * 4 + BPp * 4),
        )(w_t, patches_t, tgt)
        loss = jnp.sum(loss_vec) / jnp.float32(BP)

    # Class-major output (O, B*P) -> PyTorch layout; leading-dim swap only.
    logits = out_padded[:O, :BP].reshape(O, B, P)
    out_bop = jnp.transpose(logits, (1, 0, 2)).astype(x_nchw.dtype)  # (B, O, P)
    if targets is None:
        out = out_bop.reshape(B, O, OH, OW)     # nn.Conv2d output
    else:
        out = out_bop                           # mirrors out.view(B, out_dim, OH*OW)
    return out, loss


# -------------------------------- ConvProbe ---------------------------------- #

class ConvProbe:
    """JAX/Pallas port of the PyTorch ConvProbe forward pass."""

    def __init__(self, in_channels, out_dim, kernel_size, padding=0, nl=False,
                 key=None, block_n=512):
        if key is None:
            key = jax.random.PRNGKey(0)
        fan_in = in_channels * kernel_size * kernel_size
        bound = float(fan_in) ** -0.5
        self.weight = jax.random.uniform(
            key, (out_dim, in_channels, kernel_size, kernel_size),
            dtype=jnp.float32, minval=-bound, maxval=bound)
        self.out_dim = out_dim
        self.padding = padding
        self.block_n = block_n

    def __call__(self, x_nchw, targets=None):
        return conv_probe_forward(x_nchw, self.weight, self.padding, targets,
                                  block_n=self.block_n)


# ---------------------------------- main -------------------------------------- #

if __name__ == "__main__":
    key = jax.random.PRNGKey(0)
    k_x, k_t, k_w = jax.random.split(key, 3)

    # 16x16 input, kernel 4, padding 0 => 13x13 = 169 positions (the hard-coded
    # 169 in the PyTorch forward).
    B, C, H, W = 2, 4, 16, 16
    out_dim, ksize, padding = 8, 4, 0
    OH = OW = H - ksize + 1
    P = OH * OW

    x = jax.random.normal(k_x, (B, C, H, W), dtype=jnp.float32)
    targets = jax.random.randint(k_t, (B, P), 0, out_dim, dtype=jnp.int32)

    # block_n=128 so even the toy problem exercises a multi-step (3-tile) grid,
    # padded-position masking, and the parallel dimension semantics.
    probe = ConvProbe(C, out_dim, ksize, padding=padding, key=k_w, block_n=128)

    # Path 1: with targets (fused conv + cross-entropy kernel).
    out_train, loss = probe(x, targets)
    out_train = jax.block_until_ready(out_train)
    loss = jax.block_until_ready(loss)

    # Path 2: without targets (conv-only kernel).
    out_eval, loss_none = probe(x)
    out_eval = jax.block_until_ready(out_eval)

    # Reference: XLA conv with the same bf16 operands / f32 accumulation.
    ref_out = jax.lax.conv_general_dilated(
        x.astype(jnp.bfloat16), probe.weight.astype(jnp.bfloat16),
        window_strides=(1, 1),
        padding=[(padding, padding), (padding, padding)],
        dimension_numbers=("NCHW", "OIHW", "NCHW"),
        preferred_element_type=jnp.float32)
    ref_logits = ref_out.reshape(B, out_dim, P)
    logp = jax.nn.log_softmax(ref_logits, axis=1)
    ref_loss = -jnp.mean(jnp.take_along_axis(logp, targets[:, None, :], axis=1))

    assert out_train.shape == (B, out_dim, P), out_train.shape
    assert out_eval.shape == (B, out_dim, OH, OW), out_eval.shape
    assert loss_none is None
    assert jnp.allclose(out_train, ref_logits, atol=1e-3, rtol=1e-3), "conv mismatch"
    assert jnp.allclose(out_eval, ref_out, atol=1e-3, rtol=1e-3), "conv mismatch"
    assert jnp.allclose(loss, ref_loss, atol=1e-3, rtol=1e-3), "loss mismatch"

    print("KERNEL_OK")
</pallas_src>

<mosaic_0001>
module attributes {stable_mosaic.version = 11 : i64} {
  func.func @_conv_ce_kernel(%arg0: i32, %arg1: memref<16x64xbf16, #tpu.memory_space<vmem>>, %arg2: memref<64x128xbf16, #tpu.memory_space<vmem>>, %arg3: memref<1x128xi32, #tpu.memory_space<vmem>>, %arg4: memref<16x128xf32, #tpu.memory_space<vmem>>, %arg5: memref<1x128xf32, #tpu.memory_space<vmem>>) attributes {dimension_semantics = [#tpu.dimension_semantics<parallel>], iteration_bounds = array<i64: 3>, scalar_prefetch = 0 : i64, scratch_operands = 0 : i64, tpu.core_type = #tpu.core_type<tc>, window_params = [{pipeline_mode = #tpu.pipeline_mode<synchronous>, transform_indices = @transform_0, window_bounds = array<i64: 16, 64>}, {transform_indices = @transform_1, window_bounds = array<i64: 64, 128>}, {transform_indices = @transform_2, window_bounds = array<i64: 1, 128>}, {transform_indices = @transform_3, window_bounds = array<i64: 16, 128>}, {transform_indices = @transform_4, window_bounds = array<i64: 1, 128>}]} {
    %c0 = arith.constant 0 : index
    %c0_0 = arith.constant 0 : index
    %0 = vector.load %arg1[%c0, %c0_0] : memref<16x64xbf16, #tpu.memory_space<vmem>>, vector<16x64xbf16>
    %c0_1 = arith.constant 0 : index
    %c0_2 = arith.constant 0 : index
    %1 = vector.load %arg2[%c0_1, %c0_2] : memref<64x128xbf16, #tpu.memory_space<vmem>>, vector<64x128xbf16>
    %cst = arith.constant dense<0.000000e+00> : vector<16x128xf32>
    %2 = tpu.matmul %0, %1, %cst {dimension_numbers = #tpu.dot_dimension_numbers<[1], [0], [0], [1], [0, 0, 1, 1], [], []>} : vector<16x64xbf16>, vector<64x128xbf16>, vector<16x128xf32> -> vector<16x128xf32>
    %c0_3 = arith.constant 0 : index
    %c0_4 = arith.constant 0 : index
    %3 = vector.load %arg4[%c0_3, %c0_4] : memref<16x128xf32, #tpu.memory_space<vmem>>, vector<16x128xf32>
    tpu.vector_store %arg4[%c0_3, %c0_4], %2 {strides = array<i32>} : memref<16x128xf32, #tpu.memory_space<vmem>>, vector<16x128xf32>,
    %4 = tpu.iota {dimensions = array<i32: 0>} : vector<16x128xi32>
    %c8_i32 = arith.constant 8 : i32
    %5 = vector.broadcast %c8_i32 : i32 to vector<16x128xi32>
    %6 = arith.cmpi slt, %4, %5 : vector<16x128xi32>
    %cst_5 = arith.constant -1.000000e+30 : f32
    %7 = vector.broadcast %cst_5 : f32 to vector<16x128xf32>
    %8 = arith.select %6, %2, %7 : vector<16x128xi1>, vector<16x128xf32>
    %cst_6 = arith.constant dense<0xFF800000> : vector<128xf32>
    %9 = vector.multi_reduction <maximumf>, %8, %cst_6 [0] : vector<16x128xf32> to vector<128xf32>
    %10 = vector.shape_cast %9 : vector<128xf32> to vector<1x128xf32>
    %11 = vector.broadcast %10 : vector<1x128xf32> to vector<16x128xf32>
    %12 = arith.subf %8, %11 : vector<16x128xf32>
    %13 = math.exp %12 : vector<16x128xf32>
    %cst_7 = arith.constant dense<0.000000e+00> : vector<128xf32>
    %14 = vector.multi_reduction <add>, %13, %cst_7 [0] : vector<16x128xf32> to vector<128xf32>
    %15 = vector.shape_cast %14 : vector<128xf32> to vector<1x128xf32>
    %16 = math.log %15 : vector<1x128xf32>
    %17 = arith.addf %16, %10 : vector<1x128xf32>
    %c0_8 = arith.constant 0 : index
    %c0_9 = arith.constant 0 : index
    %18 = vector.load %arg3[%c0_8, %c0_9] : memref<1x128xi32, #tpu.memory_space<vmem>>, vector<1x128xi32>
    %19 = vector.broadcast %18 : vector<1x128xi32> to vector<16x128xi32>
    %20 = arith.cmpi eq, %4, %19 : vector<16x128xi32>
    %21 = arith.extui %20 : vector<16x128xi1> to vector<16x128xi32>
    %22 = arith.sitofp %21 : vector<16x128xi32> to vector<16x128xf32>
    %23 = arith.mulf %2, %22 : vector<16x128xf32>
    %cst_10 = arith.constant dense<0.000000e+00> : vector<128xf32>
    %24 = vector.multi_reduction <add>, %23, %cst_10 [0] : vector<16x128xf32> to vector<128xf32>
    %25 = vector.shape_cast %24 : vector<128xf32> to vector<1x128xf32>
    %c128_i32 = arith.constant 128 : i32
    %26 = arith.muli %arg0, %c128_i32 : i32
    %27 = tpu.iota {dimensions = array<i32: 1>} : vector<1x128xi32>
    %28 = vector.broadcast %26 : i32 to vector<1x128xi32>
    %29 = arith.addi %28, %27 : vector<1x128xi32>
    %c338_i32 = arith.constant 338 : i32
    %30 = vector.broadcast %c338_i32 : i32 to vector<1x128xi32>
    %31 = arith.cmpi slt, %29, %30 : vector<1x128xi32>
    %32 = arith.extui %31 : vector<1x128xi1> to vector<1x128xi32>
    %33 = arith.sitofp %32 : vector<1x128xi32> to vector<1x128xf32>
    %34 = arith.subf %17, %25 : vector<1x128xf32>
    %35 = arith.mulf %34, %33 : vector<1x128xf32>
    %c0_11 = arith.constant 0 : index
    %c0_12 = arith.constant 0 : index
    %36 = vector.load %arg5[%c0_11, %c0_12] : memref<1x128xf32, #tpu.memory_space<vmem>>, vector<1x128xf32>
    tpu.vector_store %arg5[%c0_11, %c0_12], %35 {strides = array<i32>} : memref<1x128xf32, #tpu.memory_space<vmem>>, vector<1x128xf32>,
    return
  }
  func.func @transform_0(%arg0: i32) -> (i32, i32) {
    %c0_i32 = arith.constant 0 : i32
    %c0_i32_0 = arith.constant 0 : i32
    %c0_i32_1 = arith.constant 0 : i32
    return %c0_i32, %c0_i32_0 : i32, i32
  }
  func.func @transform_1(%arg0: i32) -> (i32, i32) {
    %c0_i32 = arith.constant 0 : i32
    %c0_i32_0 = arith.constant 0 : i32
    return %c0_i32, %arg0 : i32, i32
  }
  func.func @transform_2(%arg0: i32) -> (i32, i32) {
    %c0_i32 = arith.constant 0 : i32
    %c0_i32_0 = arith.constant 0 : i32
    return %c0_i32, %arg0 : i32, i32
  }
  func.func @transform_3(%arg0: i32) -> (i32, i32) {
    %c0_i32 = arith.constant 0 : i32
    %c0_i32_0 = arith.constant 0 : i32
    return %c0_i32, %arg0 : i32, i32
  }
  func.func @transform_4(%arg0: i32) -> (i32, i32) {
    %c0_i32 = arith.constant 0 : i32
    %c0_i32_0 = arith.constant 0 : i32
    return %c0_i32, %arg0 : i32, i32
  }
}

</mosaic_0001>

<bundles_post_ra>
// kernel: tpu_custom_call.1
= control target key start
LH: loop header
LB: loop body
LE: loop exit
PB: predicated region body
PF: predicated region fallthrough
CT: control target
= control target key end

     0   :  { %s1100_s0 = inlined_call_operand.hbm [shape: bf16[16,64], index: 0, kind: input, shape index: {}]   ;;  %s1101_s1 = inlined_call_operand.hbm [shape: bf16[64,384], index: 1, kind: input, shape index: {}]   ;;  %s1102_s2 = inlined_call_operand.hbm [shape: s32[1,384], index: 2, kind: input, shape index: {}]   ;;  %s1103_s3 = inlined_call_operand.hbm [shape: f32[16,384], index: 3, kind: output, shape index: {0}]   ;;  %s1104_s4 = inlined_call_operand.hbm [shape: f32[1,384], index: 4, kind: output, shape index: {1}]  }
   0x1   :  { %1106 = sst [smem:[#allocation15_spill]] %s1100_s0 }
   0x2   :  { %10 = vsyncpa [#allocation3], 0 }
   0x3   :  { %11 = vsyncpa [#allocation6], 0 }
   0x4   :  { %13 = vsyncpa [#allocation6 + $0x1], 0 }
   0x5   :  { %14 = vsyncpa [#allocation4], 0 }
   0x6   :  { %16 = vsyncpa [#allocation4 + $0x1], 0 }
   0x7   :  { %17 = vsyncpa [#allocation10], 0 }
   0x8   :  { %19 = vsyncpa [#allocation10 + $0x1], 0  ;;  %s907_s15 = smov 0   ;;  %s909_s16 = smov 0  }
   0x9   :  { %s911_s17 = smov 0   ;;  %s913_s18 = smov 0  }
   0xa LB: > { %s928_s19 = sadd.s32 1, %s872_s18   ;;  %s53_s20 = sadd.s32 1, %s868_s17  ;;  %s872_s18 = sphi %s913_s18, %s1118_s18   ;;  %s868_s17 = sphi %s911_s17, %s1117_s17   ;;  %s864_s16 = sphi %s909_s16, %s1116_s16   ;;  %s860_s15 = sphi %s907_s15, %s1115_s15  }
   0xb   : > { %s50_s21 = ssub.s32 %s872_s18, %s928_s19  ;;  %p60_p0 = scmp.ne.s32.totalorder %s868_s17, %s864_s16 }
   0xc   : > { %p51_p1 = scmp.eq.s32.totalorder %s50_s21, 0  ;;  %p61_p2 = scmp.eq.s32.totalorder %s872_s18, 0 }
   0xd   : > { %p630_p4 = scmp.lt.s32.totalorder %s872_s18, 3  ;;  %s182_s23 = sand.u32 1, %s872_s18  }
   0xe   : > { %s937_s22 = scalar_select %p51_p1, %s868_s17, %s53_s20  }
   0xf   : > { %p62_p3 = por %p61_p2, %p60_p0  ;;  %s184_s24 = sand.u32 1, %s868_s17  }
  0x10   : > { %s559_s25 = sshll.u32 %s184_s24, 5  ;;  %s560_s26 = sshll.u32 %s872_s18, 2 }
  0x11   : > { %s190_s29 = scalar_lea.hbm %s1101_s1, %s560_s26  ;;  %s186_s5 = scalar_lea.vmem [#allocation5], %s559_s25 }
  0x12   : > { %s191_s30 = sshll.u32 %s190_s29, 4  ;;  %s193_s6 = sshll.u32 %s186_s5, 4  ;;  %s192_s30 = int_to_ptr.hbm [resolvable:$true] %s191_s30  ;;  %s194_s6 = int_to_ptr.vmem [resolvable:$true] %s193_s6 }
  0x13   : > { %p951_p5 = pnand %p630_p4, %p62_p3  ;;  %s956_s8 = sadd.s32 4294967295, %s872_s18  }
  0x14   : > { %s958_s9 = scalar_lea.sflag [#allocation6], %s182_s23  ;;  %s680_s10 = sshra.s32 %s192_s30, 4  ;;  %s681_s10 = int_to_ptr.hbm [resolvable:$true] %s680_s10 }
  0x15   : > { %s682_s11 = scalar_lea.hbm %s681_s10, 32  ;;  %p684_p7 = pneg %p951_p5 }
  0x16   : > { %p683_p6 = scmp.ne.s32.totalorder %s681_s10, %s682_s11  ;;  %s687_s14 = scalar_lea.hbm %s1101_s1, 96 }
  0x17   : > { %p688_p10 = scmp.lt.s32.totalorder %s681_s10, %s1101_s1  ;;  %p689_p11 = scmp.lt.s32.totalorder %s687_s14, %s682_s11 }
  0x18   : > { %p685_p8 = pnand %p684_p7, %p683_p6 }
  0x19   : > { %p690_p12 = por %p689_p11, %p688_p10 }
  0x1a   : > { %p686_p9 = pneg %p685_p8 }
  0x1c   : > { %p691_p13 = pnand %p690_p12, %p686_p9 }
  0x1e   : > { %694 = shalt.err (!%p691_p13)
}
  0x1f   : > { %s874_s23 = smov 192   ;;  %s875_s25 = smov 64  }
  0x20   : > { %s876_s26 = smov 4   ;;  %s555_s27 = sadd.s32 4294967294, %s872_s18  }
  0x21   : > { %618 = dma.hbm_to_vmem [thread:$0]  (!%p951_p5), %s192_s30, 512, %s194_s6, %s958_s9, %s874_s23, %s875_s25, %s876_s26  }
  0x22   : > { %p66_p1 = scmp.ne.s32.totalorder %s864_s16, %s860_s15  ;;  %p1105_p2 = scmp.eq.s32.totalorder %s956_s8, 0 }
  0x23   : > { %p116_p3 = scmp.eq.s32.totalorder %s956_s8, 2  ;;  %p122_p4 = scmp.eq.s32.totalorder %s555_s27, 2 }
  0x24   : > { %p556_p6 = scmp.ge.s32.totalorder %s872_s18, 1  ;;  %p984_p8 = por %p1105_p2, %p66_p1 }
  0x25   : > { %p991_p9 = por %p116_p3, %p60_p0  ;;  %p995_p10 = por %p122_p4, %p66_p1 }
  0x26   : > { %p155_p11 = scmp.lt.s32.totalorder %s872_s18, 4  ;;  %s1111_s0 = sld [smem:[#allocation15_spill]] }
  0x27   : > { %s877_s12 = smov [#allocation2]   ;;  %s209_s21 = scalar_lea.hbm %s1102_s2, %s872_s18 }
  0x28   : > { %p1003_p12 = pnand %p556_p6, %p155_p11  ;;  %s168_s13 = sshll.u32 %s877_s12, 4  ;;  %s169_s13 = int_to_ptr.vmem [resolvable:$true] %s168_s13 }
  0x29   : > { %s211_s23 = sshll.u32 %s209_s21, 4  ;;  %s206_s27 = scalar_lea.vmem [#allocation7], %s184_s24  ;;  %s212_s23 = int_to_ptr.hbm [resolvable:$true] %s211_s23 }
  0x2a   : > { %p611_p0 = pneg %p1003_p12  ;;  %s213_s5 = sshll.u32 %s206_s27, 4  ;;  %s214_s5 = int_to_ptr.vmem [resolvable:$true] %s213_s5 }
  0x2b   : > { %s740_s6 = sshra.s32 %s212_s23, 4  ;;  %s747_s21 = scalar_lea.hbm %s1102_s2, 3  ;;  %s741_s6 = int_to_ptr.hbm [resolvable:$true] %s740_s6 }
  0x2c   : > { %s166_s10 = sshll.u32 %s1111_s0, 4  ;;  %p612_p13 = pnand %p611_p0, %p1105_p2  ;;  %s167_s10 = int_to_ptr.hbm [resolvable:$true] %s166_s10 }
  0x2d   : > { %s742_s12 = scalar_lea.hbm %s741_s6, 1  ;;  %p748_p6 = scmp.lt.s32.totalorder %s741_s6, %s1102_s2 }
  0x2e   : > { %614 = dma.hbm_to_vmem [thread:$0]  (!%p612_p13), %s167_s10, 128, %s169_s13, [#allocation3], %s875_s25, %s875_s25, %s876_s26  }
  0x2f   : > { %p743_p1 = scmp.ne.s32.totalorder %s741_s6, %s742_s12  ;;  %p749_p11 = scmp.lt.s32.totalorder %s747_s21, %s742_s12 }
  0x31   : > { %p745_p3 = pnand %p743_p1, %p684_p7  ;;  %p750_p0 = por %p749_p11, %p748_p6 }
  0x33   : > { %p746_p4 = pneg %p745_p3 }
  0x35   : > { %p751_p2 = pnand %p750_p0, %p746_p4 }
  0x37   : > { %754 = shalt.err (!%p751_p2)
}
  0x38   : > { %621 = dma.hbm_to_vmem [thread:$0]  (!%p951_p5), %s212_s23, 16, %s214_s5, %s958_s9  }
  0x39   : > { %222 = sbr.rel (%p1003_p12) target bundleno = 267 (0x10b), region = 32  ;;  %p1113_p7 = scmp.eq.s32.totalorder (!%p1003_p12), %s956_s8, 0 }
  0x3e   : > { %843 = dma.done.wait (%p1113_p7), [#allocation3], 128   ;;  %p1114_p13 = pmov %p1113_p7 }
  0x3f   : > { %s229_s0 = sand.u32 1, %s956_s8   ;;  %s1040_s25 = sand.u32 1, %s864_s16  }
  0x40   : > { %845 = vsyncadd (%p1114_p13), [#allocation3], 4294967168  ;;  %s563_s26 = sshll.u32 %s1040_s25, 5  ;;  %s230_s7 = scalar_lea.sflag [#allocation6], %s229_s0 }
  0x41   : > { %s233_s10 = scalar_lea.vmem [#allocation5], %s563_s26 }
  0x42   : > { %847 = dma.done.wait (%p984_p8), %s230_s7, 528  }
  0x43   : > { %849 = vsyncadd (%p984_p8), %s230_s7, 4294966768  ;;  %v598_v0 = vld [vmem:[%s233_s10 + $0x18] sm:$0xff]  ;;  %v597_v1 = vld [vmem:[%s233_s10 + $0x10] sm:$0xff]  ;;  %s242_s9 = scalar_lea.vmem [#allocation7], %s1040_s25  ;;  %vm316_vm0 = vcmask 523264   ;;  %s564_s11 = sshll.u32 %s1040_s25, 4  ;;  %v336_v9 = vlaneseq }
  0x44   : > { %324 = vmatpush.bf16.msra.mxu0 %v598_v0  ;;  %v596_v2 = vld [vmem:[%s233_s10 + $0x8] sm:$0xff]  ;;  %v595_v3 = vld [vmem:[%s233_s10] sm:$0xff]  ;;  %v594_v4 = vld [vmem:[#allocation2] sm:$0xff]  ;;  %s591_s13 = sshll.u32 %s956_s8, 3  ;;  %s269_s5 = scalar_lea.vmem [#allocation8], %s564_s11 }
  0x45   : > { %s409_s27 = scalar_lea.hbm %s1103_s3, %s591_s13  ;;  %s410_s6 = sshll.u32 %s269_s5, 4  ;;  %v337_v13 = vshrl.u32 %v336_v9, 7  ;;  %s411_s6 = int_to_ptr.vmem [resolvable:$true] %s410_s6 }
  0x46   : > { %s412_s12 = sshll.u32 %s409_s27, 4  ;;  %s395_s14 = scalar_lea.sflag [#allocation4], %s1040_s25  ;;  %s413_s12 = int_to_ptr.hbm [resolvable:$true] %s412_s12 }
  0x47   : > { %s784_s20 = sshra.s32 %s413_s12, 4  ;;  %s790_s26 = scalar_lea.hbm %s1103_s3, 48  ;;  %s785_s20 = int_to_ptr.hbm [resolvable:$true] %s784_s20 }
  0x48   : > { %325 = vmatpush.bf16.msra.mxu0 %v597_v1  ;;  %s786_s21 = scalar_lea.hbm %s785_s20, 16  ;;  %p791_p12 = scmp.lt.s32.totalorder %s785_s20, %s1103_s3 }
  0x49   : > { %p787_p5 = scmp.ne.s32.totalorder %s785_s20, %s786_s21  ;;  %p792_p1 = scmp.lt.s32.totalorder %s790_s26, %s786_s21 }
  0x4b   : > { %p788_p2 = pnand %p787_p5, %p991_p9  ;;  %p793_p3 = por %p792_p1, %p791_p12 }
  0x4c   : > { %326 = vmatpush.bf16.msra.mxu0 %v596_v2 }
  0x4d   : > { %p789_p8 = pneg %p788_p2 }
  0x4f   : > { %p794_p4 = pnand %p793_p3, %p789_p8 }
  0x50   : > { %327 = vmatpush.bf16.msra.mxu0 %v595_v3 }
  0x53   : > { %585 = vmatmul.msk.bf16.vlgmr.msra.gmra.mxu0 %vm316_vm0, %v594_v4 }
  0xd0   : > { %v329_v5 = vpop.f32.mrf.mxu0 }
  0xd1   : > { %v343_v6 = vmax.f32 %v329_v5, -1e+30  ;;  %334 = vst [vmem:[%s269_s5] sm:$0xff] %v329_v5 }
  0xd3   : > { %v344_v7 = vrot.slane %v343_v6, 4 }
  0xd5   : > { %v345_v8 = vmax.f32 %v343_v6, %v344_v7 }
  0xd7   : > { %v346_v10 = vrot.slane %v345_v8, 2 }
  0xd8   : > { %v331_v11 = vpop.f32.mrf.mxu0 }
  0xd9   : > { %v347_v12 = vmax.f32 %v345_v8, %v346_v10  ;;  %335 = vst [vmem:[%s269_s5 + $0x8] sm:$0xff] %v331_v11 }
  0xda   : > { %797 = shalt.err (!%p794_p4)
}
  0xdb   : > { %s878_s11 = smov 128   ;;  %s879_s13 = smov 384   ;;  %v348_v14 = vrot.slane %v347_v12, 1  ;;  %v338_v15 = vadd.s32 8, %v337_v13  ;;  %v673_v17 = vld [vmem:[%s242_s9] ss:$0 sm:$0xff] }
  0xdc   : > { %s880_s28 = smov 8   ;;  %vm368_vm2 = vcmp.eq.s32.totalorder %v337_v13, %v673_v17  ;;  %v881_v22 = vmov 0.0   ;;  %s588_s9 = sshll.u32 %s956_s8, 7  ;;  %v385_v40 = vand.u32 127, %v336_v9 }
  0xdd   : > { %607 = dma.vmem_to_hbm [thread:$0]  (%p991_p9), %s411_s6, 256, %s413_s12, %s395_s14, %s878_s11, %s879_s13, %s880_s28   ;;  %v349_v16 = vmax.f32 %v347_v12, %v348_v14  ;;  %vm369_vm1 = vcmp.eq.s32.totalorder %v338_v15, %v673_v17  ;;  %v586_v24 = vsel %vm368_vm2, 1.0, %v881_v22 }
  0xde   : > { %v587_v23 = vsel %vm369_vm1, 1.0, %v881_v22  ;;  %v374_v26 = vmul.f32 %v586_v24, %v329_v5  ;;  %v386_v41 = vstv %s588_s9  ;;  %s424_s5 = scalar_lea.hbm %s1104_s4, %s956_s8  ;;  %s275_s6 = scalar_lea.vmem [#allocation9], %s1040_s25 }
  0xdf   : > { %v350_v18 = vsub.f32 %v329_v5, %v349_v16  ;;  %v351_v19 = vsub.f32 -1e+30, %v349_v16  ;;  %v375_v25 = vmul.f32 %v587_v23, %v331_v11  ;;  %v387_v43 = vadd.s32 %v386_v41, %v385_v40  ;;  %s426_s12 = sshll.u32 %s275_s6, 4  ;;  %s428_s14 = sshll.u32 %s424_s5, 4  ;;  %s427_s12 = int_to_ptr.vmem [resolvable:$true] %s426_s12  ;;  %s429_s14 = int_to_ptr.hbm [resolvable:$true] %s428_s14 }
  0xe0   : > { %s400_s20 = scalar_lea.sflag [#allocation10], %s1040_s25  ;;  %s812_s21 = sshra.s32 %s429_s14, 4  ;;  %s813_s21 = int_to_ptr.hbm [resolvable:$true] %s812_s21 }
  0xe1   : > { %v352_v20 = vmul.f32 1.442695, %v350_v18  ;;  %v354_v21 = vmul.f32 1.442695, %v351_v19  ;;  %v376_v29 = vadd.f32 %v375_v25, %v374_v26  ;;  %vm388_vm3 = vcmp.lt.s32.totalorder %v387_v43, 338  ;;  %s814_s24 = scalar_lea.hbm %s813_s21, 1  ;;  %p819_p7 = scmp.lt.s32.totalorder %s813_s21, %s1104_s4 }
  0xe2   : > { %v589_v49 = vsel %vm388_vm3, 1.0, %v881_v22  ;;  %p815_p6 = scmp.ne.s32.totalorder %s813_s21, %s814_s24  ;;  %s818_s26 = scalar_lea.hbm %s1104_s4, 3 }
  0xe3   : > { %674 = vpow2.f32 %v352_v20  ;;  %v377_v32 = vrot.slane %v376_v29, 4  ;;  %p820_p13 = scmp.lt.s32.totalorder %s818_s26, %s814_s24 }
  0xe4   : > { %676 = vpow2.f32 %v354_v21  ;;  %p816_p11 = pnand %p815_p6, %p991_p9 }
  0xe5   : > { %v378_v35 = vadd.f32 %v377_v32, %v376_v29  ;;  %p821_p5 = por %p820_p13, %p819_p7 }
  0xe6   : > { %p817_p0 = pneg %p816_p11 }
  0xe7   : > { %v379_v38 = vrot.slane %v378_v35, 2 }
  0xe8   : > { %p822_p2 = pnand %p821_p5, %p817_p0 }
  0xe9   : > { %v675_v27 = vpop.eup %674  ;;  %v380_v42 = vadd.f32 %v379_v38, %v378_v35 }
  0xea   : > { %v677_v28 = vpop.eup %676 }
  0xeb   : > { %v356_v30 = vadd.f32 %v677_v28, %v675_v27  ;;  %v381_v44 = vrot.slane %v380_v42, 1 }
  0xed   : > { %v357_v31 = vrot.slane %v356_v30, 4  ;;  %v382_v48 = vadd.f32 %v381_v44, %v380_v42 }
  0xef   : > { %v358_v33 = vadd.f32 %v357_v31, %v356_v30 }
  0xf1   : > { %v359_v34 = vrot.slane %v358_v33, 2 }
  0xf3   : > { %v360_v36 = vadd.f32 %v359_v34, %v358_v33 }
  0xf5   : > { %v361_v37 = vrot.slane %v360_v36, 1 }
  0xf7   : > { %v362_v39 = vadd.f32 %v361_v37, %v360_v36 }
  0xf9   : > { %678 = vlog2.f32 %v362_v39 }
  0xff   : > { %v679_v45 = vpop.eup %678 }
 0x100   : > { %v364_v46 = vmul.f32 0.6931472, %v679_v45 }
 0x102   : > { %v365_v47 = vadd.f32 %v364_v46, %v349_v16 }
 0x104   : > { %v391_v50 = vsub.f32 %v365_v47, %v382_v48 }
 0x106   : > { %v392_v51 = vmul.f32 %v589_v49, %v391_v50 }
 0x108   : > { %393 = vst [vmem:[%s275_s6] sm:$0x1] %v392_v51 }
 0x109   : > { %825 = shalt.err (!%p822_p2)
}
 0x10a   : > { %608 = dma.vmem_to_hbm [thread:$0]  (%p991_p9), %s427_s12, 16, %s429_s14, %s400_s20  }
 0x10b PF: > { %p632_p8 = scmp.ge.s32.totalorder %s872_s18, 2  ;;  %s440_s25 = sand.u32 1, %s860_s15  }
 0x10c   : > { %s441_s11 = scalar_lea.sflag [#allocation4], %s440_s25 }
 0x10d   : > { %p623_p12 = pnand %p632_p8, %p995_p10 }
 0x10f   : > { %p624_p1 = pneg %p623_p12 }
 0x111   : > { %851 = dma.done.wait (%p624_p1), %s441_s11, 256  }
 0x112   : > { %853 = vsyncadd (%p624_p1), %s441_s11, 4294967040  ;;  %s451_s13 = scalar_lea.sflag [#allocation10], %s440_s25 }
 0x113   : > { %855 = dma.done.wait (%p624_p1), %s451_s13, 16  }
 0x114   : > { %857 = vsyncadd (%p624_p1), %s451_s13, 4294967280  ;;  %p22_p9 = scmp.ge.s32.totalorder %s928_s19, 5   ;;  %s1115_s15 = smov %s864_s16 }
 0x115   : > { %s1116_s16 = smov %s868_s17  ;;  %s1117_s17 = smov %s937_s22 }
 0x116   : > { %s1118_s18 = smov %s928_s19  ;;  %24 = sbr.rel (!%p22_p9) target bundleno = 10 (0xa), region = 110 }
 0x11b   :  { %456 = vsyncpa [#allocation3], 1 }
 0x11c   :  { %458 = vsyncpa [#allocation3 + $0x1], 1 }
 0x11d   :  { %459 = vsyncpa [#allocation6], 1 }
 0x11e   :  { %461 = vsyncpa [#allocation6 + $0x1], 1 }
 0x11f   :  { %462 = vsyncpa [#allocation4], 1 }
 0x120   :  { %464 = vsyncpa [#allocation4 + $0x1], 1 }
 0x121   :  { %465 = vsyncpa [#allocation10], 1 }
 0x122   :  { %467 = vsyncpa [#allocation10 + $0x1], 1 }

</bundles_post_ra>
